<compile_context>
chip_gen: v6e
topology: v6e:2x2x1
jax: 0.10.0
libtpu: 0.0.40
codegen_flags: <defaults>
</compile_context>

<pallas_src>
import jax
import jax.numpy as jnp
from jax import lax
from jax.experimental import pallas as pl
from jax.experimental.pallas import tpu as pltpu


# --------------------------- weight preparation ------------------------------

def _fold_bn(w_oihw, bn, eps):
    """Fold eval-mode BN into the conv weights (scale) + a per-channel shift."""
    gamma, beta, mean, var = bn
    scale = gamma * lax.rsqrt(var + eps)                     # (Cout,)
    shift = beta - mean * scale                              # (Cout,)
    w_hwio = jnp.transpose(w_oihw, (2, 3, 1, 0)) * scale     # (3,3,Cin,Cout)
    return w_hwio, shift


def _band_weight(w_hwio, W):
    """(3,3,Ci,Co) taps -> per-kh block-tridiagonal matrices (3, W*Ci, W*Co).

    M[kh, w'*Ci + c, w*Co + o] = w_hwio[kh, w'-w+1, c, o] if |w'-w| <= 1 else 0,
    so that  y_flat[h] = sum_kh A[h+kh-1] @ M[kh]  computes the 3x3 conv on a
    lane-flattened activation row A[h, w*Ci + c] = x[h, w, c].  Out-of-image
    columns have no row in M, i.e. the conv's zero padding along W is built
    into the matrix (no im2col, no lane concatenation, no column pad).
    """
    _, _, ci, co = w_hwio.shape
    wp = jnp.arange(W)[:, None]                              # source column w'
    wq = jnp.arange(W)[None, :]                              # output column w
    kw = wp - wq + 1                                         # (W, W)
    valid = ((kw >= 0) & (kw <= 2)).astype(w_hwio.dtype)
    kwc = jnp.clip(kw, 0, 2)
    blocks = w_hwio[:, kwc] * valid[None, :, :, None, None]  # (3, W, W, ci, co)
    m = jnp.transpose(blocks, (0, 1, 3, 2, 4)).reshape(3, W * ci, W * co)
    return m.astype(jnp.bfloat16)


# ------------------------------ fused kernel ---------------------------------

def _double_conv_fused_nhwc(x_nhwc, w1b, s1, w2b, s2, *, out_dtype=jnp.bfloat16):
    """Fused (conv3x3 + BN + LeakyReLU) x 2; NHWC in / NHWC out; one pallas_call."""
    N, H, W, Cin = x_nhwc.shape
    WCi = W * Cin
    WCo = w2b.shape[-1]
    Cout = WCo // W

    # Lane-dense input layout (trailing dim W*Cin); no jnp.pad HBM pass, the
    # f32->bf16 cast happens in-kernel so the input is read from HBM only once.
    x_flat = x_nhwc.reshape(N, H, WCi)

    def kernel(x_ref, w1_ref, s1_ref, w2_ref, s2_ref, o_ref, a1, a2):
        f32 = jnp.float32
        zci = jnp.zeros((1, WCi), jnp.bfloat16)
        zco = jnp.zeros((1, WCo), jnp.bfloat16)

        # ---- stage 1: haloed activation rows (zero rows == conv's H padding)
        a1[pl.ds(0, 1), :] = zci
        a1[pl.ds(H + 1, 1), :] = zci
        a1[pl.ds(1, H), :] = x_ref[0].astype(jnp.bfloat16)

        y1 = (jnp.dot(a1[pl.ds(0, H), :], w1_ref[0], preferred_element_type=f32)
              + jnp.dot(a1[pl.ds(1, H), :], w1_ref[1], preferred_element_type=f32)
              + jnp.dot(a1[pl.ds(2, H), :], w1_ref[2], preferred_element_type=f32))
        y1 = y1 + s1_ref[...]                       # folded BN shift (f32)
        y1 = jnp.where(y1 >= 0, y1, 0.01 * y1)      # LeakyReLU(0.01), f32 VALU

        # ---- stage 2 (its zero halo rows are exactly conv2's zero padding)
        a2[pl.ds(0, 1), :] = zco
        a2[pl.ds(H + 1, 1), :] = zco
        a2[pl.ds(1, H), :] = y1.astype(jnp.bfloat16)

        y2 = (jnp.dot(a2[pl.ds(0, H), :], w2_ref[0], preferred_element_type=f32)
              + jnp.dot(a2[pl.ds(1, H), :], w2_ref[1], preferred_element_type=f32)
              + jnp.dot(a2[pl.ds(2, H), :], w2_ref[2], preferred_element_type=f32))
        y2 = y2 + s2_ref[...]
        y2 = jnp.where(y2 >= 0, y2, 0.01 * y2)
        # lane-dense store: last dim of the out block is W*Cout (== 128 here).
        o_ref[0] = y2.astype(o_ref.dtype)

    out = pl.pallas_call(
        kernel,
        out_shape=jax.ShapeDtypeStruct((N, H, WCo), out_dtype),
        grid_spec=pltpu.PrefetchScalarGridSpec(
            num_scalar_prefetch=0,
            grid=(N,),
            in_specs=[
                pl.BlockSpec((1, H, WCi), lambda n: (n, 0, 0)),
                # weights / shifts: resident (constant index map)
                pl.BlockSpec((3, WCi, WCo), lambda n: (0, 0, 0)),
                pl.BlockSpec((1, WCo), lambda n: (0, 0)),
                pl.BlockSpec((3, WCo, WCo), lambda n: (0, 0, 0)),
                pl.BlockSpec((1, WCo), lambda n: (0, 0)),
            ],
            out_specs=pl.BlockSpec((1, H, WCo), lambda n: (n, 0, 0)),
            scratch_shapes=[
                pltpu.VMEM((H + 2, WCi), jnp.bfloat16),   # stage-1 haloed rows
                pltpu.VMEM((H + 2, WCo), jnp.bfloat16),   # stage-2 haloed rows
            ],
        ),
        compiler_params=pltpu.CompilerParams(
            # one image per step; N >= 2 parallel steps keep both v7x TCs busy
            dimension_semantics=("parallel",),
        ),
    )(x_flat, w1b, s1, w2b, s2)

    return out.reshape(N, H, W, Cout)


def inconv_forward_nhwc(x_nhwc, params, eps=1e-5, out_dtype=jnp.bfloat16):
    """inconv forward in NHWC (residual=False, bias=False, bn=True, dim='2d')."""
    (w1, bn1), (w2, bn2) = params
    W = x_nhwc.shape[2]
    Cout = w1.shape[0]
    w1h, sh1 = _fold_bn(w1, bn1, eps)
    w2h, sh2 = _fold_bn(w2, bn2, eps)
    # NOTE: weight prep is tiny and would be hoisted / constant-folded across
    # calls in a real model (weights are static).
    w1b = _band_weight(w1h, W)                        # (3, W*Cin,  W*Cout) bf16
    w2b = _band_weight(w2h, W)                        # (3, W*Cout, W*Cout) bf16
    s1 = jnp.tile(sh1, (W,)).reshape(1, W * Cout).astype(jnp.float32)
    s2 = jnp.tile(sh2, (W,)).reshape(1, W * Cout).astype(jnp.float32)
    return _double_conv_fused_nhwc(x_nhwc, w1b, s1, w2b, s2, out_dtype=out_dtype)


def inconv_forward(x_nchw, params, eps=1e-5, out_dtype=jnp.bfloat16):
    """PyTorch-convention adapter (NCHW in / NCHW out).

    TODO(synk): in a full UNet keep activations NHWC end-to-end
    (inconv_forward_nhwc); these two transposes are extra HBM passes that exist
    only to match the NCHW API of the PyTorch module.
    """
    x = jnp.transpose(x_nchw, (0, 2, 3, 1))
    y = inconv_forward_nhwc(x, params, eps=eps, out_dtype=out_dtype)
    return jnp.transpose(y, (0, 3, 1, 2))


# ----------------------- pure-JAX reference for checking ---------------------

def _ref_forward(x_nchw, params, eps=1e-5):
    def conv(x, w):
        return lax.conv_general_dilated(
            x, w, window_strides=(1, 1), padding=((1, 1), (1, 1)),
            dimension_numbers=("NCHW", "OIHW", "NCHW"))

    def bn(x, p):
        g, b, m, v = p
        g = g[None, :, None, None]
        b = b[None, :, None, None]
        m = m[None, :, None, None]
        v = v[None, :, None, None]
        return (x - m) / jnp.sqrt(v + eps) * g + b

    def lrelu(x):
        return jnp.where(x >= 0, x, 0.01 * x)

    (w1, bn1), (w2, bn2) = params
    y = lrelu(bn(conv(x_nchw, w1), bn1))
    y = lrelu(bn(conv(y, w2), bn2))
    return y


# ---------------------------------- main -------------------------------------

if __name__ == "__main__":
    key = jax.random.PRNGKey(0)
    N, Cin, Cout, H, W = 2, 4, 8, 16, 16      # W*Cout = 128 -> lane-dense output

    ks = jax.random.split(key, 11)
    x = jax.random.normal(ks[0], (N, Cin, H, W), jnp.float32)

    # deterministic synthetic parameters (PyTorch shapes: conv OIHW, BN per-ch)
    w1 = 0.1 * jax.random.normal(ks[1], (Cout, Cin, 3, 3), jnp.float32)
    w2 = 0.1 * jax.random.normal(ks[2], (Cout, Cout, 3, 3), jnp.float32)
    bn1 = (1.0 + 0.1 * jax.random.normal(ks[3], (Cout,), jnp.float32),   # gamma
           0.1 * jax.random.normal(ks[4], (Cout,), jnp.float32),         # beta
           0.1 * jax.random.normal(ks[5], (Cout,), jnp.float32),         # running_mean
           0.5 + jax.random.uniform(ks[6], (Cout,), jnp.float32))        # running_var
    bn2 = (1.0 + 0.1 * jax.random.normal(ks[7], (Cout,), jnp.float32),
           0.1 * jax.random.normal(ks[8], (Cout,), jnp.float32),
           0.1 * jax.random.normal(ks[9], (Cout,), jnp.float32),
           0.5 + jax.random.uniform(ks[10], (Cout,), jnp.float32))

    params = ((w1, bn1), (w2, bn2))

    out = jax.block_until_ready(jax.jit(inconv_forward)(x, params))
    ref = jax.block_until_ready(_ref_forward(x, params))

    assert out.shape == (N, Cout, H, W), out.shape
    # bf16 storage policy (inputs, weights, stage-1 activations, output) with
    # f32 accumulation/epilogue vs. a pure-f32 reference: tolerance reflects
    # that deliberate dtype policy, not an algorithmic approximation.
    assert jnp.allclose(out.astype(jnp.float32), ref, atol=5e-2, rtol=5e-2), \
        float(jnp.max(jnp.abs(out.astype(jnp.float32) - ref)))

    print("KERNEL_OK")
</pallas_src>

<mosaic_0001>
module attributes {stable_mosaic.version = 11 : i64} {
  func.func @kernel(%arg0: i32, %arg1: memref<1x16x64xf32, #tpu.memory_space<vmem>>, %arg2: memref<3x64x128xbf16, #tpu.memory_space<vmem>>, %arg3: memref<1x128xf32, #tpu.memory_space<vmem>>, %arg4: memref<3x128x128xbf16, #tpu.memory_space<vmem>>, %arg5: memref<1x128xf32, #tpu.memory_space<vmem>>, %arg6: memref<1x16x128xbf16, #tpu.memory_space<vmem>>, %arg7: memref<18x64xbf16, #tpu.memory_space<vmem>>, %arg8: memref<18x128xbf16, #tpu.memory_space<vmem>>) attributes {dimension_semantics = [#tpu.dimension_semantics<parallel>], iteration_bounds = array<i64: 2>, scalar_prefetch = 0 : i64, scratch_operands = 2 : i64, tpu.core_type = #tpu.core_type<tc>, window_params = [{transform_indices = @transform_0, window_bounds = array<i64: 1, 16, 64>}, {pipeline_mode = #tpu.pipeline_mode<synchronous>, transform_indices = @transform_1, window_bounds = array<i64: 3, 64, 128>}, {pipeline_mode = #tpu.pipeline_mode<synchronous>, transform_indices = @transform_2, window_bounds = array<i64: 1, 128>}, {pipeline_mode = #tpu.pipeline_mode<synchronous>, transform_indices = @transform_3, window_bounds = array<i64: 3, 128, 128>}, {pipeline_mode = #tpu.pipeline_mode<synchronous>, transform_indices = @transform_4, window_bounds = array<i64: 1, 128>}, {transform_indices = @transform_5, window_bounds = array<i64: 1, 16, 128>}]} {
    %cst = arith.constant 0.000000e+00 : bf16
    %0 = vector.broadcast %cst : bf16 to vector<1x64xbf16>
    %cst_0 = arith.constant 0.000000e+00 : bf16
    %1 = vector.broadcast %cst_0 : bf16 to vector<1x128xbf16>
    %c0 = arith.constant 0 : index
    %c0_1 = arith.constant 0 : index
    %2 = vector.load %arg7[%c0, %c0_1] : memref<18x64xbf16, #tpu.memory_space<vmem>>, vector<1x64xbf16>
    tpu.vector_store %arg7[%c0, %c0_1], %0 {strides = array<i32>} : memref<18x64xbf16, #tpu.memory_space<vmem>>, vector<1x64xbf16>,
    %c17 = arith.constant 17 : index
    %c0_2 = arith.constant 0 : index
    %3 = vector.load %arg7[%c17, %c0_2] : memref<18x64xbf16, #tpu.memory_space<vmem>>, vector<1x64xbf16>
    tpu.vector_store %arg7[%c17, %c0_2], %0 {strides = array<i32>} : memref<18x64xbf16, #tpu.memory_space<vmem>>, vector<1x64xbf16>,
    %c0_3 = arith.constant 0 : index
    %c0_4 = arith.constant 0 : index
    %c0_5 = arith.constant 0 : index
    %4 = vector.load %arg1[%c0_3, %c0_4, %c0_5] : memref<1x16x64xf32, #tpu.memory_space<vmem>>, vector<1x16x64xf32>
    %5 = vector.shape_cast %4 : vector<1x16x64xf32> to vector<16x64xf32>
    %6 = arith.truncf %5 : vector<16x64xf32> to vector<16x64xbf16>
    %c1 = arith.constant 1 : index
    %c0_6 = arith.constant 0 : index
    %7 = vector.load %arg7[%c1, %c0_6] : memref<18x64xbf16, #tpu.memory_space<vmem>>, vector<16x64xbf16>
    tpu.vector_store %arg7[%c1, %c0_6], %6 {strides = array<i32>} : memref<18x64xbf16, #tpu.memory_space<vmem>>, vector<16x64xbf16>,
    %c0_7 = arith.constant 0 : index
    %c0_8 = arith.constant 0 : index
    %8 = vector.load %arg7[%c0_7, %c0_8] : memref<18x64xbf16, #tpu.memory_space<vmem>>, vector<16x64xbf16>
    %c0_9 = arith.constant 0 : index
    %c0_10 = arith.constant 0 : index
    %c0_11 = arith.constant 0 : index
    %9 = vector.load %arg2[%c0_9, %c0_10, %c0_11] : memref<3x64x128xbf16, #tpu.memory_space<vmem>>, vector<1x64x128xbf16>
    %10 = vector.shape_cast %9 : vector<1x64x128xbf16> to vector<64x128xbf16>
    %cst_12 = arith.constant dense<0.000000e+00> : vector<16x128xf32>
    %11 = tpu.matmul %8, %10, %cst_12 {dimension_numbers = #tpu.dot_dimension_numbers<[1], [0], [0], [1], [0, 0, 1, 1], [], []>} : vector<16x64xbf16>, vector<64x128xbf16>, vector<16x128xf32> -> vector<16x128xf32>
    %c1_13 = arith.constant 1 : index
    %c0_14 = arith.constant 0 : index
    %12 = vector.load %arg7[%c1_13, %c0_14] : memref<18x64xbf16, #tpu.memory_space<vmem>>, vector<16x64xbf16>
    %c1_15 = arith.constant 1 : index
    %c0_16 = arith.constant 0 : index
    %c0_17 = arith.constant 0 : index
    %13 = vector.load %arg2[%c1_15, %c0_16, %c0_17] : memref<3x64x128xbf16, #tpu.memory_space<vmem>>, vector<1x64x128xbf16>
    %14 = vector.shape_cast %13 : vector<1x64x128xbf16> to vector<64x128xbf16>
    %cst_18 = arith.constant dense<0.000000e+00> : vector<16x128xf32>
    %15 = tpu.matmul %12, %14, %cst_18 {dimension_numbers = #tpu.dot_dimension_numbers<[1], [0], [0], [1], [0, 0, 1, 1], [], []>} : vector<16x64xbf16>, vector<64x128xbf16>, vector<16x128xf32> -> vector<16x128xf32>
    %16 = arith.addf %11, %15 : vector<16x128xf32>
    %c2 = arith.constant 2 : index
    %c0_19 = arith.constant 0 : index
    %17 = vector.load %arg7[%c2, %c0_19] : memref<18x64xbf16, #tpu.memory_space<vmem>>, vector<16x64xbf16>
    %c2_20 = arith.constant 2 : index
    %c0_21 = arith.constant 0 : index
    %c0_22 = arith.constant 0 : index
    %18 = vector.load %arg2[%c2_20, %c0_21, %c0_22] : memref<3x64x128xbf16, #tpu.memory_space<vmem>>, vector<1x64x128xbf16>
    %19 = vector.shape_cast %18 : vector<1x64x128xbf16> to vector<64x128xbf16>
    %cst_23 = arith.constant dense<0.000000e+00> : vector<16x128xf32>
    %20 = tpu.matmul %17, %19, %cst_23 {dimension_numbers = #tpu.dot_dimension_numbers<[1], [0], [0], [1], [0, 0, 1, 1], [], []>} : vector<16x64xbf16>, vector<64x128xbf16>, vector<16x128xf32> -> vector<16x128xf32>
    %21 = arith.addf %16, %20 : vector<16x128xf32>
    %c0_24 = arith.constant 0 : index
    %c0_25 = arith.constant 0 : index
    %22 = vector.load %arg3[%c0_24, %c0_25] : memref<1x128xf32, #tpu.memory_space<vmem>>, vector<1x128xf32>
    %23 = vector.broadcast %22 : vector<1x128xf32> to vector<16x128xf32>
    %24 = arith.addf %21, %23 : vector<16x128xf32>
    %cst_26 = arith.constant 0.000000e+00 : f32
    %25 = vector.broadcast %cst_26 : f32 to vector<16x128xf32>
    %26 = arith.cmpf oge, %24, %25 : vector<16x128xf32>
    %cst_27 = arith.constant 0.00999999977 : f32
    %27 = vector.broadcast %cst_27 : f32 to vector<16x128xf32>
    %28 = arith.mulf %27, %24 : vector<16x128xf32>
    %29 = arith.select %26, %24, %28 : vector<16x128xi1>, vector<16x128xf32>
    %c0_28 = arith.constant 0 : index
    %c0_29 = arith.constant 0 : index
    %30 = vector.load %arg8[%c0_28, %c0_29] : memref<18x128xbf16, #tpu.memory_space<vmem>>, vector<1x128xbf16>
    tpu.vector_store %arg8[%c0_28, %c0_29], %1 {strides = array<i32>} : memref<18x128xbf16, #tpu.memory_space<vmem>>, vector<1x128xbf16>,
    %c17_30 = arith.constant 17 : index
    %c0_31 = arith.constant 0 : index
    %31 = vector.load %arg8[%c17_30, %c0_31] : memref<18x128xbf16, #tpu.memory_space<vmem>>, vector<1x128xbf16>
    tpu.vector_store %arg8[%c17_30, %c0_31], %1 {strides = array<i32>} : memref<18x128xbf16, #tpu.memory_space<vmem>>, vector<1x128xbf16>,
    %32 = arith.truncf %29 : vector<16x128xf32> to vector<16x128xbf16>
    %c1_32 = arith.constant 1 : index
    %c0_33 = arith.constant 0 : index
    %33 = vector.load %arg8[%c1_32, %c0_33] : memref<18x128xbf16, #tpu.memory_space<vmem>>, vector<16x128xbf16>
    tpu.vector_store %arg8[%c1_32, %c0_33], %32 {strides = array<i32>} : memref<18x128xbf16, #tpu.memory_space<vmem>>, vector<16x128xbf16>,
    %c0_34 = arith.constant 0 : index
    %c0_35 = arith.constant 0 : index
    %34 = vector.load %arg8[%c0_34, %c0_35] : memref<18x128xbf16, #tpu.memory_space<vmem>>, vector<16x128xbf16>
    %c0_36 = arith.constant 0 : index
    %c0_37 = arith.constant 0 : index
    %c0_38 = arith.constant 0 : index
    %35 = vector.load %arg4[%c0_36, %c0_37, %c0_38] : memref<3x128x128xbf16, #tpu.memory_space<vmem>>, vector<1x128x128xbf16>
    %36 = vector.shape_cast %35 : vector<1x128x128xbf16> to vector<128x128xbf16>
    %cst_39 = arith.constant dense<0.000000e+00> : vector<16x128xf32>
    %37 = tpu.matmul %34, %36, %cst_39 {dimension_numbers = #tpu.dot_dimension_numbers<[1], [0], [0], [1], [0, 0, 1, 1], [], []>} : vector<16x128xbf16>, vector<128x128xbf16>, vector<16x128xf32> -> vector<16x128xf32>
    %c1_40 = arith.constant 1 : index
    %c0_41 = arith.constant 0 : index
    %38 = vector.load %arg8[%c1_40, %c0_41] : memref<18x128xbf16, #tpu.memory_space<vmem>>, vector<16x128xbf16>
    %c1_42 = arith.constant 1 : index
    %c0_43 = arith.constant 0 : index
    %c0_44 = arith.constant 0 : index
    %39 = vector.load %arg4[%c1_42, %c0_43, %c0_44] : memref<3x128x128xbf16, #tpu.memory_space<vmem>>, vector<1x128x128xbf16>
    %40 = vector.shape_cast %39 : vector<1x128x128xbf16> to vector<128x128xbf16>
    %cst_45 = arith.constant dense<0.000000e+00> : vector<16x128xf32>
    %41 = tpu.matmul %38, %40, %cst_45 {dimension_numbers = #tpu.dot_dimension_numbers<[1], [0], [0], [1], [0, 0, 1, 1], [], []>} : vector<16x128xbf16>, vector<128x128xbf16>, vector<16x128xf32> -> vector<16x128xf32>
    %42 = arith.addf %37, %41 : vector<16x128xf32>
    %c2_46 = arith.constant 2 : index
    %c0_47 = arith.constant 0 : index
    %43 = vector.load %arg8[%c2_46, %c0_47] : memref<18x128xbf16, #tpu.memory_space<vmem>>, vector<16x128xbf16>
    %c2_48 = arith.constant 2 : index
    %c0_49 = arith.constant 0 : index
    %c0_50 = arith.constant 0 : index
    %44 = vector.load %arg4[%c2_48, %c0_49, %c0_50] : memref<3x128x128xbf16, #tpu.memory_space<vmem>>, vector<1x128x128xbf16>
    %45 = vector.shape_cast %44 : vector<1x128x128xbf16> to vector<128x128xbf16>
    %cst_51 = arith.constant dense<0.000000e+00> : vector<16x128xf32>
    %46 = tpu.matmul %43, %45, %cst_51 {dimension_numbers = #tpu.dot_dimension_numbers<[1], [0], [0], [1], [0, 0, 1, 1], [], []>} : vector<16x128xbf16>, vector<128x128xbf16>, vector<16x128xf32> -> vector<16x128xf32>
    %47 = arith.addf %42, %46 : vector<16x128xf32>
    %c0_52 = arith.constant 0 : index
    %c0_53 = arith.constant 0 : index
    %48 = vector.load %arg5[%c0_52, %c0_53] : memref<1x128xf32, #tpu.memory_space<vmem>>, vector<1x128xf32>
    %49 = vector.broadcast %48 : vector<1x128xf32> to vector<16x128xf32>
    %50 = arith.addf %47, %49 : vector<16x128xf32>
    %cst_54 = arith.constant 0.000000e+00 : f32
    %51 = vector.broadcast %cst_54 : f32 to vector<16x128xf32>
    %52 = arith.cmpf oge, %50, %51 : vector<16x128xf32>
    %cst_55 = arith.constant 0.00999999977 : f32
    %53 = vector.broadcast %cst_55 : f32 to vector<16x128xf32>
    %54 = arith.mulf %53, %50 : vector<16x128xf32>
    %55 = arith.select %52, %50, %54 : vector<16x128xi1>, vector<16x128xf32>
    %56 = arith.truncf %55 : vector<16x128xf32> to vector<16x128xbf16>
    %c0_56 = arith.constant 0 : index
    %c0_57 = arith.constant 0 : index
    %c0_58 = arith.constant 0 : index
    %57 = vector.load %arg6[%c0_56, %c0_57, %c0_58] : memref<1x16x128xbf16, #tpu.memory_space<vmem>>, vector<1x16x128xbf16>
    %58 = vector.shape_cast %57 : vector<1x16x128xbf16> to vector<16x128xbf16>
    %59 = vector.shape_cast %56 : vector<16x128xbf16> to vector<1x16x128xbf16>
    tpu.vector_store %arg6[%c0_56, %c0_57, %c0_58], %59 {strides = array<i32>} : memref<1x16x128xbf16, #tpu.memory_space<vmem>>, vector<1x16x128xbf16>,
    return
  }
  func.func @transform_0(%arg0: i32) -> (i32, i32, i32) {
    %c0_i32 = arith.constant 0 : i32
    %c0_i32_0 = arith.constant 0 : i32
    %c0_i32_1 = arith.constant 0 : i32
    return %arg0, %c0_i32, %c0_i32_0 : i32, i32, i32
  }
  func.func @transform_1(%arg0: i32) -> (i32, i32, i32) {
    %c0_i32 = arith.constant 0 : i32
    %c0_i32_0 = arith.constant 0 : i32
    %c0_i32_1 = arith.constant 0 : i32
    %c0_i32_2 = arith.constant 0 : i32
    return %c0_i32, %c0_i32_0, %c0_i32_1 : i32, i32, i32
  }
  func.func @transform_2(%arg0: i32) -> (i32, i32) {
    %c0_i32 = arith.constant 0 : i32
    %c0_i32_0 = arith.constant 0 : i32
    %c0_i32_1 = arith.constant 0 : i32
    return %c0_i32, %c0_i32_0 : i32, i32
  }
  func.func @transform_3(%arg0: i32) -> (i32, i32, i32) {
    %c0_i32 = arith.constant 0 : i32
    %c0_i32_0 = arith.constant 0 : i32
    %c0_i32_1 = arith.constant 0 : i32
    %c0_i32_2 = arith.constant 0 : i32
    return %c0_i32, %c0_i32_0, %c0_i32_1 : i32, i32, i32
  }
  func.func @transform_4(%arg0: i32) -> (i32, i32) {
    %c0_i32 = arith.constant 0 : i32
    %c0_i32_0 = arith.constant 0 : i32
    %c0_i32_1 = arith.constant 0 : i32
    return %c0_i32, %c0_i32_0 : i32, i32
  }
  func.func @transform_5(%arg0: i32) -> (i32, i32, i32) {
    %c0_i32 = arith.constant 0 : i32
    %c0_i32_0 = arith.constant 0 : i32
    %c0_i32_1 = arith.constant 0 : i32
    return %arg0, %c0_i32, %c0_i32_0 : i32, i32, i32
  }
}

</mosaic_0001>

<bundles_post_ra>
// kernel: tile.13
= control target key start
LH: loop header
LB: loop body
LE: loop exit
PB: predicated region body
PF: predicated region fallthrough
CT: control target
= control target key end

     0   :  { %s28_s0 = inlined_call_operand.vmem [shape: f32[8], index: 0, kind: input, shape index: {}]   ;;  %s29_s1 = inlined_call_operand.vmem [shape: f32[16,8], index: 1, kind: output, shape index: {}]  }
   0x1   :  { %v4_v0 = vld [vmem:[%s28_s0] ss:$0 sm:$0xff] }
   0x2   :  { %5 = vst [vmem:[%s29_s1] sm:$0xff] %v4_v0  ;;  %8 = vst [vmem:[%s29_s1 + $0x8] sm:$0xff] %v4_v0 }

// kernel: tile.14
= control target key start
LH: loop header
LB: loop body
LE: loop exit
PB: predicated region body
PF: predicated region fallthrough
CT: control target
= control target key end

     0   :  { %s133_s10 = smov 120   ;;  %s134_s11 = smov 104   ;;  %vm3_vm0 = vcmask 64512   ;;  %vm9_vm1 = vcmask 1048512   ;;  %vm15_vm2 = vcmask 982912   ;;  %vm21_vm3 = vcmask 917312   ;;  %s209_s0 = inlined_call_operand.vmem [shape: f32[16,8], index: 0, kind: input, shape index: {}]   ;;  %s210_s1 = inlined_call_operand.vmem [shape: f32[1,128], index: 1, kind: output, shape index: {}]  }
   0x1   :  { %v103_v0 = vld [vmem:[%s209_s0 + $0xf] sm:$0x1]   ;;  %v105_v1 = vld [vmem:[%s209_s0 + $0xd] sm:$0x1]   ;;  %v104_v2 = vld [vmem:[%s209_s0 + $0xe] sm:$0x1]  }
   0x2   :  { %7 = vrot.lane.b32.xlu0 %v103_v0, %s133_s10  ;;  %19 = vrot.lane.b32.xlu1 %v105_v1, %s134_s11  ;;  %v106_v3 = vld [vmem:[%s209_s0 + $0xc] sm:$0x1]   ;;  %s135_s16 = smov 112   ;;  %s136_s17 = smov 96   ;;  %v107_v4 = vld [vmem:[%s209_s0 + $0xb] sm:$0x1]  }
   0x3   :  { %v108_v5 = vld [vmem:[%s209_s0 + $0xa] sm:$0x1]   ;;  %v2_v6 = vld [vmem:[%s209_s0] sm:$0x1]   ;;  %s137_s24 = smov 88   ;;  %s138_s25 = smov 80  }
   0x4   :  { %4 = vst.msk [vmem:[#allocation0] sm:$0x1] %vm3_vm0, %v2_v6   ;;  %v109_v7 = vld [vmem:[%s209_s0 + $0x9] sm:$0x1]   ;;  %v110_v8 = vld [vmem:[%s209_s0 + $0x8] sm:$0x1]  }
   0x5   :  { %s139_s30 = smov 72   ;;  %s140_s2 = smov 64   ;;  %v111_v9 = vld [vmem:[%s209_s0 + $0x7] sm:$0x1]   ;;  %v112_v10 = vld [vmem:[%s209_s0 + $0x6] sm:$0x1]  }
   0x6   :  { %13 = vrot.lane.b32.xlu0 %v104_v2, %s135_s16  ;;  %25 = vrot.lane.b32.xlu1 %v106_v3, %s136_s17  ;;  %s141_s7 = smov 56   ;;  %s142_s8 = smov 48   ;;  %v113_v11 = vld [vmem:[%s209_s0 + $0x5] sm:$0x1]   ;;  %v114_v12 = vld [vmem:[%s209_s0 + $0x4] sm:$0x1]  }
   0x7   :  { %s143_s13 = smov 40   ;;  %s144_s14 = smov 32   ;;  %v115_v13 = vld [vmem:[%s209_s0 + $0x3] sm:$0x1]   ;;  %v116_v14 = vld [vmem:[%s209_s0 + $0x2] sm:$0x1]  }
   0x8   :  { %s145_s19 = smov 24   ;;  %s146_s20 = smov 16   ;;  %v117_v15 = vld [vmem:[%s209_s0 + $0x1] sm:$0x1]   ;;  %vm27_vm4 = vcmask 851712   ;;  %vm33_vm5 = vcmask 786112  }
   0x9   :  { %s147_s0 = smov 8   ;;  %vm39_vm6 = vcmask 720512   ;;  %vm45_vm7 = vcmask 654912   ;;  %vm51_vm8 = vcmask 589312   ;;  %vm57_vm9 = vcmask 523712  }
   0xa   :  { %31 = vrot.lane.b32.xlu0 %v107_v4, %s137_s24  ;;  %37 = vrot.lane.b32.xlu1 %v108_v5, %s138_s25  ;;  %vm63_vm10 = vcmask 458112   ;;  %vm69_vm11 = vcmask 392512   ;;  %vm75_vm12 = vcmask 326912   ;;  %vm81_vm13 = vcmask 261312  }
   0xb   :  { %vm87_vm14 = vcmask 195712   ;;  %vm93_vm15 = vcmask 130112  }
   0xe   :  { %43 = vrot.lane.b32.xlu0 %v109_v7, %s139_s30  ;;  %49 = vrot.lane.b32.xlu1 %v110_v8, %s140_s2 }
  0x12   :  { %55 = vrot.lane.b32.xlu0 %v111_v9, %s141_s7  ;;  %61 = vrot.lane.b32.xlu1 %v112_v10, %s142_s8 }
  0x16   :  { %67 = vrot.lane.b32.xlu0 %v113_v11, %s143_s13  ;;  %73 = vrot.lane.b32.xlu1 %v114_v12, %s144_s14 }
  0x1a   :  { %79 = vrot.lane.b32.xlu0 %v115_v13, %s145_s19  ;;  %85 = vrot.lane.b32.xlu1 %v116_v14, %s146_s20 }
  0x1e   :  { %91 = vrot.lane.b32.xlu0 %v117_v15, %s147_s0 }
  0x74   :  { %v8_v16 = vpop.permute.xlu0 %7   ;;  %v20_v17 = vpop.permute.xlu1 %19  }
  0x75   :  { %10 = vst.msk [vmem:[#allocation0] sm:$0x1] %vm9_vm1, %v8_v16  }
  0x78   :  { %v14_v18 = vpop.permute.xlu0 %13   ;;  %v26_v19 = vpop.permute.xlu1 %25  }
  0x79   :  { %16 = vst.msk [vmem:[#allocation0] sm:$0x1] %vm15_vm2, %v14_v18  }
  0x7a   :  { %22 = vst.msk [vmem:[#allocation0] sm:$0x1] %vm21_vm3, %v20_v17  }
  0x7b   :  { %28 = vst.msk [vmem:[#allocation0] sm:$0x1] %vm27_vm4, %v26_v19  }
  0x7c   :  { %v32_v20 = vpop.permute.xlu0 %31   ;;  %v38_v21 = vpop.permute.xlu1 %37  }
  0x7d   :  { %34 = vst.msk [vmem:[#allocation0] sm:$0x1] %vm33_vm5, %v32_v20  }
  0x7e   :  { %40 = vst.msk [vmem:[#allocation0] sm:$0x1] %vm39_vm6, %v38_v21  }
  0x80   :  { %v44_v22 = vpop.permute.xlu0 %43   ;;  %v50_v23 = vpop.permute.xlu1 %49  }
  0x81   :  { %46 = vst.msk [vmem:[#allocation0] sm:$0x1] %vm45_vm7, %v44_v22  }
  0x82   :  { %52 = vst.msk [vmem:[#allocation0] sm:$0x1] %vm51_vm8, %v50_v23  }
  0x84   :  { %v56_v24 = vpop.permute.xlu0 %55   ;;  %v62_v25 = vpop.permute.xlu1 %61  }
  0x85   :  { %58 = vst.msk [vmem:[#allocation0] sm:$0x1] %vm57_vm9, %v56_v24  }
  0x86   :  { %64 = vst.msk [vmem:[#allocation0] sm:$0x1] %vm63_vm10, %v62_v25  }
  0x88   :  { %v68_v26 = vpop.permute.xlu0 %67   ;;  %v74_v27 = vpop.permute.xlu1 %73  }
  0x89   :  { %70 = vst.msk [vmem:[#allocation0] sm:$0x1] %vm69_vm11, %v68_v26  }
  0x8a   :  { %76 = vst.msk [vmem:[#allocation0] sm:$0x1] %vm75_vm12, %v74_v27  }
  0x8c   :  { %v80_v28 = vpop.permute.xlu0 %79   ;;  %v86_v29 = vpop.permute.xlu1 %85  }
  0x8d   :  { %82 = vst.msk [vmem:[#allocation0] sm:$0x1] %vm81_vm13, %v80_v28  }
  0x8e   :  { %88 = vst.msk [vmem:[#allocation0] sm:$0x1] %vm87_vm14, %v86_v29  }
  0x90   :  { %v92_v30 = vpop.permute.xlu0 %91  }
  0x91   :  { %94 = vst.msk [vmem:[#allocation0] sm:$0x1] %vm93_vm15, %v92_v30  }
  0x98   :  { %v99_v31 = vld [vmem:[#allocation0] sm:$0x1] }
  0x99   :  { %102 = vst [vmem:[%s210_s1] sm:$0x1] %v99_v31 }

// kernel: inconv_forward.1
= control target key start
LH: loop header
LB: loop body
LE: loop exit
PB: predicated region body
PF: predicated region fallthrough
CT: control target
= control target key end

     0   :  { %s1387_s18 = smov 0   ;;  %s1612_s0 = inlined_call_operand.vmem [shape: f32[2,16,64], index: 0, kind: input, shape index: {}]   ;;  %s1613_s1 = inlined_call_operand.vmem [shape: bf16[3,64,128], index: 1, kind: input, shape index: {}]   ;;  %s1614_s2 = inlined_call_operand.vmem [shape: f32[1,128], index: 2, kind: input, shape index: {}]   ;;  %s1615_s3 = inlined_call_operand.vmem [shape: bf16[3,128,128], index: 3, kind: input, shape index: {}]   ;;  %s1616_s4 = inlined_call_operand.vmem [shape: f32[1,128], index: 4, kind: input, shape index: {}]   ;;  %s1617_s5 = inlined_call_operand.vmem [shape: bf16[2,16,128], index: 5, kind: output, shape index: {}]  }
   0x1 LB: > { %s1032_s19 = sadd.s32 4294967295, %s1353_s18   ;;  %p1036_p0 = scmp.ge.s32.totalorder %s1353_s18, 1  ;;  %s1353_s18 = sphi %s1387_s18, %s15_s18  }
   0x2   : > { %p187_p1 = scmp.lt.s32.totalorder %s1353_s18, 3 }
   0x4   : > { %p188_p2 = pnand %p1036_p0, %p187_p1 }
   0x5   : > { %p215_p3 = scmp.lt.s32.totalorder (!%p188_p2), %s1032_s19, 1 }
   0x6   : > { %191 = sbr.rel (%p188_p2) target bundleno = 527 (0x20f), region = 40 }
   0xb   : > { %v1305_v0 = vld [vmem:[%s1613_s1 + $0x38] sm:$0xff]   ;;  %v1355_v1 = vmov 0.0   ;;  %v1307_v3 = vld [vmem:[%s1613_s1 + $0x30] sm:$0xff]   ;;  %vm1356_vm0 = vmmov 0   ;;  %s1625_s19 = smov (!%p215_p3, %s1032_s19), 1  ;;  %vm226_vm1 = vcmask 516096  }
   0xc   : > { %1199 = vmatprep.subr.bf16.mxu0 %v1355_v1  ;;  %1211 = vmatprep.subr.bf16.mxu1 %v1355_v1  ;;  %v1306_v2 = vld [vmem:[%s1613_s1 + $0x18] sm:$0xff]   ;;  %v1308_v4 = vld [vmem:[%s1613_s1 + $0x10] sm:$0xff]   ;;  %v1309_v5 = vld [vmem:[%s1613_s1 + $0x28] sm:$0xff]   ;;  %s1144_s30 = sshll.u32 %s1625_s19, 4  ;;  %vm227_vm2 = vsmask.f32 256 }
   0xd   : > { %1200 = vmatpush3.bf16.msra.mxu0 %v1305_v0  ;;  %1207 = vmatprep.mubr.msk.bf16.mxu0 %vm1356_vm0, %v1355_v1  ;;  %v1310_v6 = vld [vmem:[%s1613_s1 + $0x8] sm:$0xff]   ;;  %s219_s10 = scalar_lea.vmem %s1612_s0, %s1144_s30  ;;  %v1311_v7 = vld [vmem:[%s1613_s1 + $0x20] sm:$0xff]   ;;  %vm232_vm3 = vsmask.f32 7938  ;;  %vm1434_vm4 = vmand %vm226_vm1, %vm227_vm2  ;;  %vm245_vm6 = vsmask.f32 4368 }
   0xe   : > { %1212 = vmatpush3.bf16.msra.mxu1 %v1306_v2  ;;  %1201 = vmatprep.subr.bf16.mxu0 %v1355_v1  ;;  %v229_v8 = vld [vmem:[#allocation2] sm:$0x1]  ;;  %v234_v10 = vld [vmem:[#allocation2 + $0x8] sm:$0x1]  ;;  %vm233_vm5 = vmand %vm226_vm1, %vm232_vm3  ;;  %vm267_vm7 = vcmask 519168   ;;  %vm342_vm10 = vcmask 523264  }
   0xf   : > { %1213 = vmatprep.subr.bf16.mxu1 %v1355_v1  ;;  %1219 = vmatprep.mubr.msk.bf16.mxu1 %vm1356_vm0, %v1355_v1  ;;  %v237_v11 = vld [vmem:[%s219_s10] sm:$0xff]  ;;  %v230_v12 = vsel %vm1434_vm4, 0, %v229_v8  ;;  %v238_v13 = vld [vmem:[%s219_s10 + $0x8] sm:$0xff]  ;;  %v235_v16 = vsel %vm233_vm5, 0, %v234_v10  ;;  %vm1449_vm8 = vmor %vm227_vm2, %vm245_vm6  ;;  %vm305_vm11 = vsmask.f32 7424 }
  0x10   : > { %v1146_v14 = vpack.c.bf16 %v237_v11, %v237_v11  ;;  %v1312_v15 = vld [vmem:[%s1613_s1] sm:$0xff]   ;;  %231 = vst [vmem:[#allocation2] sm:$0x1] %v230_v12  ;;  %v1147_v17 = vpack.c.bf16 %v238_v13, %v238_v13  ;;  %236 = vst [vmem:[#allocation2 + $0x8] sm:$0x1] %v235_v16  ;;  %v1315_v43 = vld [vmem:[%s1613_s1 + $0x58] sm:$0xff]  }
  0x11   : > { %1202 = vmatpush3.bf16.msra.mxu0 %v1307_v3  ;;  %vm268_vm9 = vmand %vm267_vm7, %vm232_vm3  ;;  %v1316_v46 = vld [vmem:[%s1613_s1 + $0x50] sm:$0xff]   ;;  %v1317_v48 = vld [vmem:[%s1613_s1 + $0x48] sm:$0xff]   ;;  %vm467_vm12 = vcmask 1046528   ;;  %vm556_vm13 = vcmask 1040384   ;;  %s1145_s6 = sshll.u32 %s1625_s19, 3 }
  0x12   : > { %1214 = vmatpush3.bf16.msra.mxu1 %v1308_v4  ;;  %1203 = vmatprep.subr.bf16.mxu0 %v1355_v1  ;;  %v248_v18 = vshrl.u32 %v1146_v14, 16  ;;  %v251_v19 = vshll.u32 %v1146_v14, 16  ;;  %v256_v20 = vshrl.u32 %v1147_v17, 16  ;;  %v259_v21 = vshll.u32 %v1147_v17, 16  ;;  %v1318_v50 = vld [vmem:[%s1613_s1 + $0x40] sm:$0xff]   ;;  %v1320_v54 = vld [vmem:[%s1615_s3 + $0x38] sm:$0xff]   ;;  %vm1500_vm14 = vmand %vm556_vm13, %vm227_vm2  ;;  %s224_s9 = scalar_lea.vmem %s1617_s5, %s1145_s6 }
  0x13   : > { %1215 = vmatprep.subr.bf16.mxu1 %v1355_v1  ;;  %v1321_v55 = vld [vmem:[%s1615_s3 + $0x30] sm:$0xff]   ;;  %v1322_v56 = vld [vmem:[%s1615_s3 + $0x78] sm:$0xff]   ;;  %v558_v58 = vld [vmem:[#allocation3] sm:$0x1] }
  0x14   : > { %v250_v22 = vrot.slane %v248_v18, 7  ;;  %v258_v24 = vrot.slane %v256_v20, 7  ;;  %v1323_v59 = vld [vmem:[%s1615_s3 + $0x28] sm:$0xff]   ;;  %v559_v60 = vsel %vm1500_vm14, 0, %v558_v58  ;;  %v1324_v61 = vld [vmem:[%s1615_s3 + $0x70] sm:$0xff]   ;;  %vm561_vm15 = vmand %vm556_vm13, %vm232_vm3 }
  0x15   : > { %1204 = vmatpush3.bf16.msra.mxu0 %v1309_v5  ;;  %560 = vst [vmem:[#allocation3] sm:$0x1] %v559_v60  ;;  %v562_v62 = vld [vmem:[#allocation3 + $0x8] sm:$0x1]  ;;  %v1325_v63 = vld [vmem:[%s1615_s3 + $0x20] sm:$0xff]   ;;  %v1326_v2 = vld [vmem:[%s1615_s3 + $0x68] sm:$0xff]  }
  0x16   : > { %1216 = vmatpush3.bf16.msra.mxu1 %v1310_v6  ;;  %1205 = vmatprep.subr.bf16.mxu0 %v1355_v1  ;;  %v253_v25 = vor.u32 %v251_v19, %v250_v22  ;;  %v254_v26 = vrot.slane %v250_v22, 4  ;;  %v261_v27 = vor.u32 %v259_v21, %v258_v24  ;;  %v263_v28 = vrot.slane %v258_v24, 4  ;;  %v1327_v3 = vld [vmem:[%s1615_s3 + $0x18] sm:$0xff]   ;;  %v1328_v4 = vld [vmem:[%s1615_s3 + $0x60] sm:$0xff]   ;;  %v1329_v5 = vld [vmem:[%s1615_s3 + $0x10] sm:$0xff]  }
  0x17   : > { %1217 = vmatprep.subr.bf16.mxu1 %v1355_v1  ;;  %v269_v29 = vld [vmem:[#allocation2] sm:$0xf]  ;;  %v274_v32 = vld [vmem:[#allocation2 + $0x8] sm:$0x1]  ;;  %v563_v0 = vsel %vm561_vm15, 0, %v562_v62  ;;  %v1330_v6 = vld [vmem:[%s1615_s3 + $0x58] sm:$0xff]  }
  0x18   : > { %v262_v30 = vsel %vm1449_vm8, %v254_v26, %v261_v27  ;;  %v270_v31 = vsel %vm268_vm9, %v253_v25, %v269_v29  ;;  %v275_v33 = vsel %vm1434_vm4, %v263_v28, %v274_v32  ;;  %564 = vst [vmem:[#allocation3 + $0x8] sm:$0x1] %v563_v0  ;;  %v1332_v8 = vld [vmem:[%s1615_s3 + $0x50] sm:$0xff]   ;;  %v1333_v9 = vld [vmem:[%s1615_s3] sm:$0xff]   ;;  %v1334_v10 = vld [vmem:[%s1615_s3 + $0x48] sm:$0xff]   ;;  %vm591_vm4 = vcmask 1043456  }
  0x19   : > { %1206 = vmatpush3.bf16.msra.mxu0 %v1311_v7  ;;  %271 = vst [vmem:[#allocation2] sm:$0xf] %v270_v31  ;;  %273 = vst.msk [vmem:[#allocation2 + $0x4] sm:$0xf] %vm267_vm7, %v262_v30  ;;  %v1331_v7 = vld [vmem:[%s1615_s3 + $0x8] sm:$0xff]   ;;  %v1336_v11 = vld [vmem:[%s1615_s3 + $0x40] sm:$0xff]  }
  0x1a   : > { %1218 = vmatpush3.bf16.msra.mxu1 %v1312_v15  ;;  %1223 = vmatprep.subr.bf16.mxu0 %v1355_v1  ;;  %276 = vst [vmem:[#allocation2 + $0x8] sm:$0x1] %v275_v33  ;;  %v1077_v22 = vld [vmem:[%s1614_s2] ss:$0 sm:$0xff]  ;;  %vm592_vm5 = vmand %vm591_vm4, %vm232_vm3  ;;  %v1338_v23 = vld [vmem:[%s1615_s3 + $0xb8] sm:$0xff]  }
  0x1b   : > { %1235 = vmatprep.subr.bf16.mxu1 %v1355_v1  ;;  %v1339_v0 = vld [vmem:[%s1615_s3 + $0xb0] sm:$0xff]  }
  0x20   : > { %v277_v34 = vld [vmem:[#allocation2] sm:$0xf]  ;;  %v278_v35 = vld [vmem:[#allocation2 + $0x4] sm:$0xf] }
  0x21   : > { %v1051_v36 = vcombine.low %v277_v34, %v278_v35  ;;  %v1314_v37 = vld [vmem:[#allocation2 + $0x8] ss:$0 sps:$4 sm:$0x11]   ;;  %v454_v47 = vld [vmem:[#allocation2] sm:$0xe] }
  0x22   : > { %v314_v40 = vshll.u32 %v1314_v37, 16  ;;  %v1071_v49 = vcombine.low %v454_v47, %v278_v35  ;;  %v469_v52 = vrot.slane %v1314_v37, 1  ;;  %v597_v47 = vld [vmem:[#allocation3 + $0x8] sm:$0x1] }
  0x23   : > { %v307_v38 = vshrl.u32 %v1051_v36, 16  ;;  %v309_v39 = vshll.u32 %v1051_v36, 16  ;;  %1220 = vmatmul.mubr.msk.bf16.vlgmr.msra.gmra.mxu1 %vm342_vm10, %v1051_v36 }
  0x24   : > { %1251 = vmatprep.mubr.msk.bf16.mxu1 %vm1356_vm0, %v1355_v1  ;;  %v316_v42 = vrot.slane %v314_v40, 1  ;;  %v468_v51 = vrot.slane %v1071_v49, 1  ;;  %1236 = vmatpush3.bf16.msra.mxu1 %v1322_v56 }
  0x25   : > { %v311_v41 = vrot.slane %v309_v39, 1  ;;  %1237 = vmatprep.subr.bf16.mxu1 %v1355_v1 }
  0x26   : > { %v470_v53 = vsel %vm467_vm12, %v468_v51, %v469_v52 }
  0x27   : > { %v312_v44 = vor.u32 %v311_v41, %v307_v38  ;;  %v593_v41 = vld [vmem:[#allocation3] sm:$0xf] }
  0x28   : > { %1238 = vmatpush3.bf16.msra.mxu1 %v1324_v61 }
  0x29   : > { %v317_v45 = vsel %vm305_vm11, %v312_v44, %v316_v42  ;;  %1239 = vmatprep.subr.bf16.mxu1 %v1355_v1 }
  0x2a   : > { %1208 = vmatmul.mubr.msk.bf16.vlgmr.msra.gmra.mxu0 %vm342_vm10, %v317_v45 }
  0x2b   : > { %1224 = vmatpush3.bf16.msra.mxu0 %v1315_v43  ;;  %1231 = vmatprep.mubr.msk.bf16.mxu0 %vm1356_vm0, %v1355_v1 }
  0x2c   : > { %1225 = vmatprep.subr.bf16.mxu0 %v1355_v1  ;;  %1240 = vmatpush3.bf16.msra.mxu1 %v1326_v2  ;;  %v1340_v2 = vld [vmem:[%s1615_s3 + $0xa8] sm:$0xff]  }
  0x2d   : > { %1241 = vmatprep.subr.bf16.mxu1 %v1355_v1 }
  0x2f   : > { %1226 = vmatpush3.bf16.msra.mxu0 %v1316_v46 }
  0x30   : > { %1227 = vmatprep.subr.bf16.mxu0 %v1355_v1  ;;  %1242 = vmatpush3.bf16.msra.mxu1 %v1328_v4  ;;  %v1342_v4 = vld [vmem:[%s1615_s3 + $0x98] sm:$0xff]  }
  0x31   : > { %1243 = vmatprep.subr.bf16.mxu1 %v1355_v1 }
  0x33   : > { %1228 = vmatpush3.bf16.msra.mxu0 %v1317_v48 }
  0x34   : > { %1229 = vmatprep.subr.bf16.mxu0 %v1355_v1  ;;  %1244 = vmatpush3.bf16.msra.mxu1 %v1330_v6  ;;  %v1344_v6 = vld [vmem:[%s1615_s3 + $0x88] sm:$0xff]  }
  0x35   : > { %1245 = vmatprep.subr.bf16.mxu1 %v1355_v1 }
  0x37   : > { %1230 = vmatpush3.bf16.msra.mxu0 %v1318_v50 }
  0x38   : > { %1255 = vmatprep.subr.bf16.mxu0 %v1355_v1  ;;  %1246 = vmatpush3.bf16.msra.mxu1 %v1332_v8 }
  0x39   : > { %1247 = vmatprep.subr.bf16.mxu1 %v1355_v1 }
  0x3a   : > { %1232 = vmatmul.mubr.msk.bf16.vlgmr.msra.gmra.mxu0 %vm342_vm10, %v470_v53 }
  0x3b   : > { %1271 = vmatprep.mubr.msk.bf16.mxu0 %vm1356_vm0, %v1355_v1  ;;  %1256 = vmatpush3.bf16.msra.mxu0 %v1320_v54 }
  0x3c   : > { %1257 = vmatprep.subr.bf16.mxu0 %v1355_v1  ;;  %1248 = vmatpush3.bf16.msra.mxu1 %v1334_v10 }
  0x3d   : > { %1249 = vmatprep.subr.bf16.mxu1 %v1355_v1 }
  0x3f   : > { %1258 = vmatpush3.bf16.msra.mxu0 %v1321_v55 }
  0x40   : > { %1259 = vmatprep.subr.bf16.mxu0 %v1355_v1  ;;  %1250 = vmatpush3.bf16.msra.mxu1 %v1336_v11 }
  0x41   : > { %1275 = vmatprep.subr.bf16.mxu1 %v1355_v1 }
  0x43   : > { %1260 = vmatpush3.bf16.msra.mxu0 %v1323_v59 }
  0x44   : > { %1261 = vmatprep.subr.bf16.mxu0 %v1355_v1 }
  0x47   : > { %1262 = vmatpush3.bf16.msra.mxu0 %v1325_v63 }
  0x48   : > { %1263 = vmatprep.subr.bf16.mxu0 %v1355_v1 }
  0x4b   : > { %1264 = vmatpush3.bf16.msra.mxu0 %v1327_v3  ;;  %v1341_v3 = vld [vmem:[%s1615_s3 + $0xa0] sm:$0xff]  }
  0x4c   : > { %1265 = vmatprep.subr.bf16.mxu0 %v1355_v1 }
  0x4f   : > { %1266 = vmatpush3.bf16.msra.mxu0 %v1329_v5  ;;  %v1343_v5 = vld [vmem:[%s1615_s3 + $0x90] sm:$0xff]  }
  0x50   : > { %1267 = vmatprep.subr.bf16.mxu0 %v1355_v1 }
  0x53   : > { %1268 = vmatpush3.bf16.msra.mxu0 %v1331_v7 }
  0x54   : > { %1269 = vmatprep.subr.bf16.mxu0 %v1355_v1 }
  0x57   : > { %1270 = vmatpush3.bf16.msra.mxu0 %v1333_v9  ;;  %v1345_v9 = vld [vmem:[%s1615_s3 + $0x80] sm:$0xff]  }
  0xe3   : > { %v447_v12 = vpop.f32.mrf.mxu1 }
  0xe5   : > { %v1221_v13 = vpop.f32.mrf.mxu1 }
  0xe7   : > { %v450_v14 = vpop.f32.mrf.mxu1 }
  0xe9   : > { %v1222_v15 = vpop.f32.mrf.mxu1 }
  0xea   : > { %v380_v16 = vpop.f32.mrf.mxu0 }
  0xeb   : > { %v448_v20 = vadd.f32 %v447_v12, %v380_v16 }
  0xec   : > { %v1209_v17 = vpop.f32.mrf.mxu0 }
  0xee   : > { %v383_v18 = vpop.f32.mrf.mxu0 }
  0xef   : > { %v451_v26 = vadd.f32 %v450_v14, %v383_v18 }
  0xf0   : > { %v1210_v19 = vpop.f32.mrf.mxu0 }
  0xfa   : > { %v532_v21 = vpop.f32.mrf.mxu0 }
  0xfb   : > { %v539_v24 = vadd.f32 %v532_v21, %v448_v20 }
  0xfc   : > { %v1233_v25 = vpop.f32.mrf.mxu0 }
  0xfd   : > { %v548_v27 = vadd.f32 %v1077_v22, %v539_v24 }
  0xfe   : > { %v535_v28 = vpop.f32.mrf.mxu0 }
  0xff   : > { %vm550_vm1 = vcmp.ge.f32.partialorder %v548_v27, 0.0  ;;  %v552_v29 = vmul.f32 0.01, %v548_v27  ;;  %v540_v30 = vadd.f32 %v535_v28, %v451_v26 }
 0x100   : > { %v1234_v31 = vpop.f32.mrf.mxu0 }
 0x101   : > { %v554_v32 = vsel %vm550_vm1, %v548_v27, %v552_v29  ;;  %v549_v33 = vadd.f32 %v1077_v22, %v540_v30 }
 0x102   : > { %v1148_v34 = vpack.c.bf16 %v554_v32, %v554_v32 }
 0x103   : > { %vm551_vm2 = vcmp.ge.f32.partialorder %v549_v33, 0.0  ;;  %v553_v35 = vmul.f32 0.01, %v549_v33 }
 0x104   : > { %v572_v36 = vshrl.u32 %v1148_v34, 16  ;;  %v575_v39 = vshll.u32 %v1148_v34, 16 }
 0x105   : > { %v555_v37 = vsel %vm551_vm2, %v549_v33, %v553_v35 }
 0x106   : > { %v574_v38 = vrot.slane %v572_v36, 7  ;;  %v1149_v40 = vpack.c.bf16 %v555_v37, %v555_v37 }
 0x108   : > { %v577_v42 = vor.u32 %v575_v39, %v574_v38  ;;  %v580_v43 = vshrl.u32 %v1149_v40, 16  ;;  %v583_v46 = vshll.u32 %v1149_v40, 16  ;;  %v578_v48 = vrot.slane %v574_v38, 4 }
 0x10a   : > { %v594_v44 = vsel %vm592_vm5, %v577_v42, %v593_v41  ;;  %v582_v45 = vrot.slane %v580_v43, 7 }
 0x10b   : > { %595 = vst [vmem:[#allocation3] sm:$0xf] %v594_v44 }
 0x10c   : > { %v585_v49 = vor.u32 %v583_v46, %v582_v45  ;;  %v587_v50 = vrot.slane %v582_v45, 4 }
 0x10e   : > { %v586_v51 = vsel %vm1449_vm8, %v578_v48, %v585_v49  ;;  %v598_v52 = vsel %vm1500_vm14, %v587_v50, %v597_v47 }
 0x10f   : > { %596 = vst [vmem:[#allocation3 + $0x4] sm:$0xf] %v586_v51  ;;  %599 = vst [vmem:[#allocation3 + $0x8] sm:$0x1] %v598_v52 }
 0x112   : > { %v600_v53 = vld [vmem:[#allocation3] sm:$0xf] }
 0x113   : > { %v836_v7 = vld [vmem:[#allocation3] sm:$0xe] }
 0x116   : > { %v601_v54 = vld [vmem:[#allocation3 + $0x4] sm:$0xf]  ;;  %v1337_v56 = vld [vmem:[#allocation3 + $0x8] ss:$0 sps:$4 sm:$0x11]  }
 0x117   : > { %v1096_v55 = vcombine.low %v600_v53, %v601_v54  ;;  %v652_v59 = vshll.u32 %v1337_v56, 16  ;;  %v1130_v8 = vcombine.low %v836_v7, %v601_v54  ;;  %v858_v11 = vrot.slane %v1337_v56, 1 }
 0x119   : > { %1272 = vmatmul.mubr.bf16.vlgmr.msra.gmra.mxu0 %v1096_v55  ;;  %v647_v58 = vshll.u32 %v1096_v55, 16  ;;  %v645_v60 = vshrl.u32 %v1096_v55, 16  ;;  %v654_v63 = vrot.slane %v652_v59, 1  ;;  %v857_v10 = vrot.slane %v1130_v8, 1 }
 0x11b   : > { %v649_v61 = vrot.slane %v647_v58, 1  ;;  %v859_v12 = vsel %vm467_vm12, %v857_v10, %v858_v11 }
 0x11d   : > { %v650_v62 = vor.u32 %v649_v61, %v645_v60 }
 0x11f   : > { %v655_v57 = vsel %vm305_vm11, %v650_v62, %v654_v63 }
 0x120   : > { %1252 = vmatmul.mubr.bf16.vlgmr.msra.gmra.mxu1 %v655_v57 }
 0x121   : > { %1276 = vmatpush3.bf16.msra.mxu1 %v1338_v23  ;;  %1291 = vmatprep.mubr.msk.bf16.mxu1 %vm1356_vm0, %v1355_v1 }
 0x122   : > { %1277 = vmatprep.subr.bf16.mxu1 %v1355_v1 }
 0x125   : > { %1278 = vmatpush3.bf16.msra.mxu1 %v1339_v0 }
 0x126   : > { %1279 = vmatprep.subr.bf16.mxu1 %v1355_v1 }
 0x129   : > { %1280 = vmatpush3.bf16.msra.mxu1 %v1340_v2 }
 0x12a   : > { %1281 = vmatprep.subr.bf16.mxu1 %v1355_v1 }
 0x12d   : > { %1282 = vmatpush3.bf16.msra.mxu1 %v1341_v3 }
 0x12e   : > { %1283 = vmatprep.subr.bf16.mxu1 %v1355_v1 }
 0x131   : > { %1284 = vmatpush3.bf16.msra.mxu1 %v1342_v4 }
 0x132   : > { %1285 = vmatprep.subr.bf16.mxu1 %v1355_v1 }
 0x135   : > { %1286 = vmatpush3.bf16.msra.mxu1 %v1343_v5 }
 0x136   : > { %1287 = vmatprep.subr.bf16.mxu1 %v1355_v1 }
 0x139   : > { %1288 = vmatpush3.bf16.msra.mxu1 %v1344_v6 }
 0x13a   : > { %1289 = vmatprep.subr.bf16.mxu1 %v1355_v1  ;;  %v1139_v1 = vld [vmem:[%s1616_s4] ss:$0 sm:$0xff] }
 0x13d   : > { %1290 = vmatpush3.bf16.msra.mxu1 %v1345_v9 }
 0x140   : > { %1292 = vmatmul.mubr.bf16.vlgmr.msra.gmra.mxu1 %v859_v12 }
 0x1d9   : > { %v829_v13 = vpop.f32.mrf.mxu0 }
 0x1db   : > { %v1273_v14 = vpop.f32.mrf.mxu0 }
 0x1dd   : > { %v832_v15 = vpop.f32.mrf.mxu0 }
 0x1df   : > { %v1274_v16 = vpop.f32.mrf.mxu0 }
 0x1e0   : > { %v739_v17 = vpop.f32.mrf.mxu1 }
 0x1e1   : > { %v830_v21 = vadd.f32 %v829_v13, %v739_v17 }
 0x1e2   : > { %v1253_v18 = vpop.f32.mrf.mxu1 }
 0x1e4   : > { %v742_v19 = vpop.f32.mrf.mxu1 }
 0x1e5   : > { %v833_v26 = vadd.f32 %v832_v15, %v742_v19 }
 0x1e6   : > { %v1254_v20 = vpop.f32.mrf.mxu1 }
 0x200   : > { %v943_v22 = vpop.f32.mrf.mxu1 }
 0x201   : > { %v950_v24 = vadd.f32 %v943_v22, %v830_v21 }
 0x202   : > { %v1293_v25 = vpop.f32.mrf.mxu1 }
 0x203   : > { %v959_v27 = vadd.f32 %v1139_v1, %v950_v24 }
 0x204   : > { %v946_v28 = vpop.f32.mrf.mxu1 }
 0x205   : > { %v951_v29 = vadd.f32 %v946_v28, %v833_v26  ;;  %v963_v31 = vmul.f32 0.01, %v959_v27  ;;  %vm961_vm0 = vcmp.ge.f32.partialorder %v959_v27, 0.0 }
 0x206   : > { %v1294_v30 = vpop.f32.mrf.mxu1 }
 0x207   : > { %v960_v32 = vadd.f32 %v1139_v1, %v951_v29  ;;  %v965_v34 = vsel %vm961_vm0, %v959_v27, %v963_v31 }
 0x209   : > { %vm962_vm3 = vcmp.ge.f32.partialorder %v960_v32, 0.0  ;;  %v964_v33 = vmul.f32 0.01, %v960_v32 }
 0x20b   : > { %v966_v35 = vsel %vm962_vm3, %v960_v32, %v964_v33 }
 0x20c   : > { %v1155_v36 = vpack.c.bf16 %v966_v35, %v965_v34 }
 0x20e   : > { %1156 = vst [vmem:[%s224_s9] sm:$0xff] %v1155_v36  }
 0x20f PF: > { %s15_s18 = sadd.s32 1, %s1353_s18  }
 0x210   : > { %p12_p4 = scmp.ge.s32.totalorder %s15_s18, 4  }
 0x212   :  { %14 = sbr.rel (!%p12_p4) target bundleno = 1 (0x1), region = 74 }

</bundles_post_ra>
